<compile_context>
chip_gen: v6e
topology: v6e:2x2x1
jax: 0.10.0
libtpu: 0.0.40
codegen_flags: <defaults>
</compile_context>

<pallas_src>
import jax
import jax.numpy as jnp
from jax.experimental import pallas as pl
from jax.experimental.pallas import tpu as pltpu


HIDDEN = 200  # logical hidden width (matches the PyTorch module)


def _round_up(x: int, m: int) -> int:
    return ((x + m - 1) // m) * m


def actor_kernel(x_ref, w1_ref, b1_ref, w2_ref, b2_ref, logp_ref):
    # Layer 1: ReLU(x @ W1 + b1) — MXU matmul with f32 accumulation.
    x = x_ref[...]
    w1 = w1_ref[...]
    h = jnp.dot(x.astype(w1.dtype), w1, preferred_element_type=jnp.float32)
    h = jnp.maximum(h + b1_ref[...], 0.0)

    # Layer 2: logits = h @ W2 + b2.  Padded action lanes carry b2 = -1e30 and
    # zero W2 columns, so no in-kernel mask is required (numerics unchanged).
    w2 = w2_ref[...]
    logits = jnp.dot(h.astype(w2.dtype), w2, preferred_element_type=jnp.float32)
    logits = logits + b2_ref[...]

    # Categorical(logits=...) normalization == log_softmax over the action axis.
    # max/sum hit the XLU, exp/log hit the EUP -> off the VPU critical path.
    m = jnp.max(logits, axis=-1, keepdims=True)
    z = logits - m
    lse = jnp.log(jnp.sum(jnp.exp(z), axis=-1, keepdims=True))
    logp_ref[...] = (z - lse).astype(logp_ref.dtype)


def prepare_actor_params(w1, b1, w2, b2, *, compute_dtype=jnp.float32):
    """Pad Actor weights ONCE (not per forward call) to MXU/lane friendly shapes.

    Padding is numerically exact: zero-padded W1 columns / W2 rows contribute
    nothing through ReLU + matmul, and padded action lanes get b2 = -1e30 so
    their post-softmax probability is exactly 0.
    """
    F, H = w1.shape
    A = w2.shape[1]
    HP = max(_round_up(H, 256), 256)   # hidden padded to 256-wide MXU tiles
    AP = max(_round_up(A, 128), 128)   # action axis padded to exactly one 128-lane tile for small A

    w1p = jnp.zeros((F, HP), compute_dtype).at[:, :H].set(w1.astype(compute_dtype))
    b1p = jnp.zeros((1, HP), jnp.float32).at[:, :H].set(b1.reshape(1, H).astype(jnp.float32))
    w2p = jnp.zeros((HP, AP), compute_dtype).at[:H, :A].set(w2.astype(compute_dtype))
    b2p = (jnp.full((1, AP), -1e30, jnp.float32)
           .at[:, :A].set(b2.reshape(1, A).astype(jnp.float32)))
    return (w1p, b1p, w2p, b2p, A)


def _choose_tile_and_vmem(B, F, HP, AP, tile_b):
    """Pick a batch tile (multiple of 8) and a VMEM limit that fit v7x's 64 MiB."""
    # Fewer, fuller grid steps: size TB so the last (ragged) tile isn't mostly waste.
    tb = max(8, min(int(tile_b), _round_up(B, 8)))
    n_steps = max(1, -(-B // tb))
    TB = _round_up(-(-B // n_steps), 8)

    # VMEM budget (bytes): double-buffered x / output tiles, (double-buffered)
    # resident weights, plus the live hidden intermediate (f32 sizing is a
    # conservative bound even if weights are bf16).
    weight_bytes = 2 * 4 * (F * HP + HP + HP * AP + AP)

    def budget(t):
        return 2 * 4 * t * F + 2 * 4 * t * AP + 4 * t * HP + weight_bytes

    cap = 48 * 1024 * 1024          # headroom under v7x's 64 MiB physical VMEM
    while TB > 8 and budget(TB) > cap:
        TB -= 8

    vmem_limit = int(min(max(budget(TB) + (8 << 20), 32 << 20), 64 << 20))
    return TB, vmem_limit


def actor_forward(x, params, *, tile_b=1024):
    """Actor MLP + Categorical normalization in a single Pallas call.

    x:      (B, feature_dim) f32
    params: output of prepare_actor_params(...)
    returns log_probs (B, action_dim) f32 == Categorical(logits=net(x)).logits
    """
    w1p, b1p, w2p, b2p, A = params
    B, F = x.shape
    HP = w1p.shape[1]
    AP = w2p.shape[1]

    TB, vmem_limit = _choose_tile_and_vmem(B, F, HP, AP, tile_b)
    grid = (pl.cdiv(B, TB),)   # ragged last block: no wrapper-side batch padding

    cost = pl.CostEstimate(
        flops=2 * B * (F * HP + HP * AP),
        transcendentals=B * (AP + 1),
        bytes_accessed=4 * (B * F + F * HP + HP + HP * AP + AP + B * AP),
    )

    logp_padded = pl.pallas_call(
        actor_kernel,
        out_shape=jax.ShapeDtypeStruct((B, AP), jnp.float32),
        grid_spec=pltpu.PrefetchScalarGridSpec(
            num_scalar_prefetch=0,
            grid=grid,
            in_specs=[
                pl.BlockSpec((TB, F), lambda i: (i, 0)),    # x tile: streamed
                pl.BlockSpec((F, HP), lambda i: (0, 0)),    # W1: VMEM-resident
                pl.BlockSpec((1, HP), lambda i: (0, 0)),    # b1: resident
                pl.BlockSpec((HP, AP), lambda i: (0, 0)),   # W2: resident
                pl.BlockSpec((1, AP), lambda i: (0, 0)),    # b2: resident (-1e30 pad lanes)
            ],
            out_specs=pl.BlockSpec((TB, AP), lambda i: (i, 0)),
        ),
        compiler_params=pltpu.CompilerParams(
            dimension_semantics=("parallel",),   # megacore-shard batch on v7x
            vmem_limit_bytes=vmem_limit,
        ),
        cost_estimate=cost,
    )(x, w1p, b1p, w2p, b2p)

    # Padded action lanes have probability exactly 0; slice them off so the
    # result over the real A actions equals Categorical(logits=net(x)).logits.
    return logp_padded[:, :A]


def init_actor_params(key, feature_dim, action_dim):
    """Deterministic init mimicking torch.nn.Linear default (U[-1/sqrt(fan_in), 1/sqrt(fan_in)])."""
    k1, k2, k3, k4 = jax.random.split(key, 4)
    bound1 = 1.0 / jnp.sqrt(feature_dim)
    bound2 = 1.0 / jnp.sqrt(HIDDEN)
    w1 = jax.random.uniform(k1, (feature_dim, HIDDEN), jnp.float32, -bound1, bound1)
    b1 = jax.random.uniform(k2, (HIDDEN,), jnp.float32, -bound1, bound1)
    w2 = jax.random.uniform(k3, (HIDDEN, action_dim), jnp.float32, -bound2, bound2)
    b2 = jax.random.uniform(k4, (action_dim,), jnp.float32, -bound2, bound2)
    return w1, b1, w2, b2


def reference_forward(x, w1, b1, w2, b2):
    h = jnp.maximum(x @ w1 + b1[None, :], 0.0)
    logits = h @ w2 + b2[None, :]
    return jax.nn.log_softmax(logits, axis=-1)


if __name__ == "__main__":
    key = jax.random.PRNGKey(0)
    kx, kp = jax.random.split(key)

    batch = 8
    feature_dim = 32
    action_dim = 6

    x = jax.random.normal(kx, (batch, feature_dim), jnp.float32)
    w1, b1, w2, b2 = init_actor_params(kp, feature_dim, action_dim)

    # Pad the parameters ONCE (hoisted out of the per-call path).
    params = prepare_actor_params(w1, b1, w2, b2)

    log_probs = jax.block_until_ready(actor_forward(x, params))

    ref_log_probs = reference_forward(x, w1, b1, w2, b2)
    assert log_probs.shape == (batch, action_dim)
    assert jnp.allclose(log_probs, ref_log_probs, atol=1e-4, rtol=1e-4)
    # Categorical semantics: normalized log-probs sum to 1 in probability space.
    assert jnp.allclose(jnp.sum(jnp.exp(log_probs), axis=-1), 1.0, atol=1e-4)

    print("KERNEL_OK")
</pallas_src>

<mosaic_0001>
module attributes {stable_mosaic.version = 11 : i64} {
  func.func @actor_kernel(%arg0: i32, %arg1: memref<8x32xf32, #tpu.memory_space<vmem>>, %arg2: memref<32x256xf32, #tpu.memory_space<vmem>>, %arg3: memref<1x256xf32, #tpu.memory_space<vmem>>, %arg4: memref<256x128xf32, #tpu.memory_space<vmem>>, %arg5: memref<1x128xf32, #tpu.memory_space<vmem>>, %arg6: memref<8x128xf32, #tpu.memory_space<vmem>>) attributes {dimension_semantics = [#tpu.dimension_semantics<parallel>], iteration_bounds = array<i64: 1>, scalar_prefetch = 0 : i64, scratch_operands = 0 : i64, tpu.core_type = #tpu.core_type<tc>, window_params = [{transform_indices = @transform_0, window_bounds = array<i64: 8, 32>}, {pipeline_mode = #tpu.pipeline_mode<synchronous>, transform_indices = @transform_1, window_bounds = array<i64: 32, 256>}, {pipeline_mode = #tpu.pipeline_mode<synchronous>, transform_indices = @transform_2, window_bounds = array<i64: 1, 256>}, {pipeline_mode = #tpu.pipeline_mode<synchronous>, transform_indices = @transform_3, window_bounds = array<i64: 256, 128>}, {pipeline_mode = #tpu.pipeline_mode<synchronous>, transform_indices = @transform_4, window_bounds = array<i64: 1, 128>}, {transform_indices = @transform_5, window_bounds = array<i64: 8, 128>}]} {
    %c0 = arith.constant 0 : index
    %c0_0 = arith.constant 0 : index
    %0 = vector.load %arg1[%c0, %c0_0] : memref<8x32xf32, #tpu.memory_space<vmem>>, vector<8x32xf32>
    %c0_1 = arith.constant 0 : index
    %c0_2 = arith.constant 0 : index
    %1 = vector.load %arg2[%c0_1, %c0_2] : memref<32x256xf32, #tpu.memory_space<vmem>>, vector<32x256xf32>
    %cst = arith.constant dense<0.000000e+00> : vector<8x256xf32>
    %2 = tpu.matmul %0, %1, %cst {dimension_numbers = #tpu.dot_dimension_numbers<[1], [0], [0], [1], [0, 0, 1, 1], [], []>} : vector<8x32xf32>, vector<32x256xf32>, vector<8x256xf32> -> vector<8x256xf32>
    %c0_3 = arith.constant 0 : index
    %c0_4 = arith.constant 0 : index
    %3 = vector.load %arg3[%c0_3, %c0_4] : memref<1x256xf32, #tpu.memory_space<vmem>>, vector<1x256xf32>
    %4 = vector.broadcast %3 : vector<1x256xf32> to vector<8x256xf32>
    %5 = arith.addf %2, %4 : vector<8x256xf32>
    %cst_5 = arith.constant 0.000000e+00 : f32
    %6 = vector.broadcast %cst_5 : f32 to vector<8x256xf32>
    %7 = arith.maximumf %5, %6 : vector<8x256xf32>
    %c0_6 = arith.constant 0 : index
    %c0_7 = arith.constant 0 : index
    %8 = vector.load %arg4[%c0_6, %c0_7] : memref<256x128xf32, #tpu.memory_space<vmem>>, vector<256x128xf32>
    %cst_8 = arith.constant dense<0.000000e+00> : vector<8x128xf32>
    %9 = tpu.matmul %7, %8, %cst_8 {dimension_numbers = #tpu.dot_dimension_numbers<[1], [0], [0], [1], [0, 0, 1, 1], [], []>} : vector<8x256xf32>, vector<256x128xf32>, vector<8x128xf32> -> vector<8x128xf32>
    %c0_9 = arith.constant 0 : index
    %c0_10 = arith.constant 0 : index
    %10 = vector.load %arg5[%c0_9, %c0_10] : memref<1x128xf32, #tpu.memory_space<vmem>>, vector<1x128xf32>
    %11 = vector.broadcast %10 : vector<1x128xf32> to vector<8x128xf32>
    %12 = arith.addf %9, %11 : vector<8x128xf32>
    %cst_11 = arith.constant dense<0xFF800000> : vector<8xf32>
    %13 = vector.multi_reduction <maximumf>, %12, %cst_11 [1] : vector<8x128xf32> to vector<8xf32>
    %14 = vector.shape_cast %13 : vector<8xf32> to vector<8x1xf32>
    %15 = vector.broadcast %14 : vector<8x1xf32> to vector<8x128xf32>
    %16 = arith.subf %12, %15 : vector<8x128xf32>
    %17 = math.exp %16 : vector<8x128xf32>
    %cst_12 = arith.constant dense<0.000000e+00> : vector<8xf32>
    %18 = vector.multi_reduction <add>, %17, %cst_12 [1] : vector<8x128xf32> to vector<8xf32>
    %19 = vector.shape_cast %18 : vector<8xf32> to vector<8x1xf32>
    %20 = math.log %19 : vector<8x1xf32>
    %21 = vector.broadcast %20 : vector<8x1xf32> to vector<8x128xf32>
    %22 = arith.subf %16, %21 : vector<8x128xf32>
    %c0_13 = arith.constant 0 : index
    %c0_14 = arith.constant 0 : index
    %23 = vector.load %arg6[%c0_13, %c0_14] : memref<8x128xf32, #tpu.memory_space<vmem>>, vector<8x128xf32>
    tpu.vector_store %arg6[%c0_13, %c0_14], %22 {strides = array<i32>} : memref<8x128xf32, #tpu.memory_space<vmem>>, vector<8x128xf32>,
    return
  }
  func.func @transform_0(%arg0: i32) -> (i32, i32) {
    %c0_i32 = arith.constant 0 : i32
    %c0_i32_0 = arith.constant 0 : i32
    return %arg0, %c0_i32 : i32, i32
  }
  func.func @transform_1(%arg0: i32) -> (i32, i32) {
    %c0_i32 = arith.constant 0 : i32
    %c0_i32_0 = arith.constant 0 : i32
    %c0_i32_1 = arith.constant 0 : i32
    return %c0_i32, %c0_i32_0 : i32, i32
  }
  func.func @transform_2(%arg0: i32) -> (i32, i32) {
    %c0_i32 = arith.constant 0 : i32
    %c0_i32_0 = arith.constant 0 : i32
    %c0_i32_1 = arith.constant 0 : i32
    return %c0_i32, %c0_i32_0 : i32, i32
  }
  func.func @transform_3(%arg0: i32) -> (i32, i32) {
    %c0_i32 = arith.constant 0 : i32
    %c0_i32_0 = arith.constant 0 : i32
    %c0_i32_1 = arith.constant 0 : i32
    return %c0_i32, %c0_i32_0 : i32, i32
  }
  func.func @transform_4(%arg0: i32) -> (i32, i32) {
    %c0_i32 = arith.constant 0 : i32
    %c0_i32_0 = arith.constant 0 : i32
    %c0_i32_1 = arith.constant 0 : i32
    return %c0_i32, %c0_i32_0 : i32, i32
  }
  func.func @transform_5(%arg0: i32) -> (i32, i32) {
    %c0_i32 = arith.constant 0 : i32
    %c0_i32_0 = arith.constant 0 : i32
    return %arg0, %c0_i32 : i32, i32
  }
}

</mosaic_0001>

<bundles_post_ra>
// kernel: tpu_custom_call.1
= control target key start
LH: loop header
LB: loop body
LE: loop exit
PB: predicated region body
PF: predicated region fallthrough
CT: control target
= control target key end

     0   :  { %10 = vsyncpa [#allocation3], 0  ;;  %s487_s0 = inlined_call_operand.hbm [shape: f32[8,32], index: 0, kind: input, shape index: {}]   ;;  %s488_s1 = inlined_call_operand.hbm [shape: f32[32,256], index: 1, kind: input, shape index: {}]   ;;  %s489_s2 = inlined_call_operand.vmem [shape: f32[1,256], index: 2, kind: input, shape index: {}]   ;;  %s490_s3 = inlined_call_operand.hbm [shape: f32[256,128], index: 3, kind: input, shape index: {}]   ;;  %s491_s4 = inlined_call_operand.vmem [shape: f32[1,128], index: 4, kind: input, shape index: {}]   ;;  %s492_s5 = inlined_call_operand.hbm [shape: f32[8,128], index: 5, kind: output, shape index: {}]  }
   0x1   :  { %11 = vsyncpa [#allocation6], 0 }
   0x2   :  { %12 = vsyncpa [#allocation4], 0  ;;  %s430_s18 = smov [#allocation5]  }
   0x3   :  { %s28_s19 = sshll.u32 %s430_s18, 4  ;;  %s29_s19 = int_to_ptr.vmem [resolvable:$true] %s28_s19 }
   0x4   :  { %s352_s20 = scalar_lea.vmem %s29_s19, 1024  ;;  %p357_p1 = scmp.lt.s32.totalorder %s29_s19, %s29_s19 }
   0x5   :  { %p353_p0 = scmp.ne.s32.totalorder %s29_s19, %s352_s20  ;;  %p358_p2 = scmp.lt.s32.totalorder %s352_s20, %s352_s20 }
   0x7   :  { %p359_p3 = por %p358_p2, %p357_p1 }
   0x9   :  { %p360_p4 = pnand %p359_p3, %p353_p0 }
   0xb   :  { %363 = shalt.err (!%p360_p4)
}
   0xc   :  { %s431_s21 = smov 256   ;;  %s432_s22 = smov 16  }
   0xd   :  { %34 = dma.hbm_to_vmem [thread:$0]  %s488_s1, 1024, %s29_s19, [#allocation6], %s431_s21, %s431_s21, %s432_s22  }
   0xe   :  { %s433_s25 = smov [#allocation2]   ;;  %s434_s27 = smov [#allocation7]  }
   0xf   :  { %s19_s26 = sshll.u32 %s433_s25, 4  ;;  %s42_s28 = sshll.u32 %s434_s27, 4  ;;  %s20_s26 = int_to_ptr.vmem [resolvable:$true] %s19_s26  ;;  %s43_s28 = int_to_ptr.vmem [resolvable:$true] %s42_s28 }
  0x10   :  { %s372_s29 = scalar_lea.vmem %s20_s26, 128  ;;  %p377_p6 = scmp.lt.s32.totalorder %s20_s26, %s20_s26 }
  0x11   :  { %p373_p5 = scmp.ne.s32.totalorder %s20_s26, %s372_s29  ;;  %p378_p7 = scmp.lt.s32.totalorder %s372_s29, %s372_s29 }
  0x13   :  { %p379_p8 = por %p378_p7, %p377_p6 }
  0x15   :  { %p380_p9 = pnand %p379_p8, %p373_p5 }
  0x17   :  { %383 = shalt.err (!%p380_p9)
}
  0x18   :  { %22 = dma.hbm_to_vmem [thread:$0]  %s487_s0, 128, %s20_s26, [#allocation3]  }
  0x19   :  { %s392_s7 = scalar_lea.vmem %s43_s28, 4096  ;;  %p397_p11 = scmp.lt.s32.totalorder %s43_s28, %s43_s28 }
  0x1a   :  { %p393_p10 = scmp.ne.s32.totalorder %s43_s28, %s392_s7  ;;  %p398_p12 = scmp.lt.s32.totalorder %s392_s7, %s392_s7 }
  0x1c   :  { %p399_p13 = por %p398_p12, %p397_p11 }
  0x1e   :  { %p400_p0 = pnand %p399_p13, %p393_p10 }
  0x20   :  { %403 = shalt.err (!%p400_p0)
}
  0x21   :  { %s435_s1 = smov 128   ;;  %s436_s8 = smov 8  }
  0x22   :  { %48 = dma.hbm_to_vmem [thread:$0]  %s490_s3, 4096, %s43_s28, [#allocation6], %s435_s1, %s435_s1, %s436_s8  }
  0x23   :  { %424 = dma.done.wait [#allocation3], 128  }
  0x24   :  { %425 = vsyncadd [#allocation3], 4294967168 }
  0x25   :  { %426 = dma.done.wait [#allocation6], 5120  }
  0x26   :  { %427 = vsyncadd [#allocation6], 4294962176  ;;  %v437_v0 = vmov 0.0   ;;  %v68_v1 = vld [vmem:[#allocation5 + $0x38] sm:$0xff]  ;;  %v67_v2 = vld [vmem:[#allocation5 + $0x30] sm:$0xff]  ;;  %vm81_vm0 = vcmask 261120   ;;  %v71_v42 = vlaneseq }
  0x27   :  { %149 = vmatprep.mubr.f32.mxu0 %v437_v0  ;;  %v66_v3 = vld [vmem:[#allocation5 + $0x28] sm:$0xff]  ;;  %109 = vmatprep.subr.mxu0 %v68_v1  ;;  %v65_v4 = vld [vmem:[#allocation5 + $0x20] sm:$0xff]  ;;  %v64_v5 = vld [vmem:[#allocation5 + $0x18] sm:$0xff] }
  0x28   :  { %110 = vmatpush1.msra.mxu0 %v67_v2  ;;  %v63_v6 = vld [vmem:[#allocation5 + $0x10] sm:$0xff]  ;;  %v189_v7 = vld [vmem:[#allocation7 + $0xf8] sm:$0xff]  ;;  %v62_v10 = vld [vmem:[#allocation5 + $0x8] sm:$0xff]  ;;  %v72_v43 = vshrl.u32 %v71_v42, 7 }
  0x29   :  { %111 = vmatprep.subr.mxu0 %v66_v3  ;;  %v173_v8 = vld [vmem:[#allocation7 + $0x78] sm:$0xff]  ;;  %v188_v9 = vld [vmem:[#allocation7 + $0xf0] sm:$0xff]  ;;  %296 = vmatprep.subr.mxu1 %v189_v7  ;;  %v61_v12 = vld [vmem:[#allocation5] sm:$0xff] }
  0x2a   :  { %112 = vmatpush1.msra.mxu0 %v65_v4  ;;  %v172_v11 = vld [vmem:[#allocation7 + $0x70] sm:$0xff]  ;;  %297 = vmatpush3.msra.mxu1 %v173_v8  ;;  %v187_v13 = vld [vmem:[#allocation7 + $0xe8] sm:$0xff]  ;;  %v60_v14 = vld [vmem:[#allocation2] sm:$0xff]  ;;  %v73_v44 = vsub.s32 0, %v72_v43  ;;  %v77_v46 = vsub.s32 1, %v72_v43 }
  0x2b   :  { %113 = vmatprep.subr.mxu0 %v64_v5  ;;  %298 = vmatprep.subr.mxu1 %v188_v9  ;;  %v171_v15 = vld [vmem:[#allocation7 + $0x68] sm:$0xff]  ;;  %v186_v16 = vld [vmem:[#allocation7 + $0xe0] sm:$0xff]  ;;  %v185_v18 = vld [vmem:[#allocation7 + $0xd8] sm:$0xff] }
  0x2c   :  { %114 = vmatpush1.msra.mxu0 %v63_v6  ;;  %299 = vmatpush3.msra.mxu1 %v172_v11  ;;  %v170_v17 = vld [vmem:[#allocation7 + $0x60] sm:$0xff]  ;;  %v169_v19 = vld [vmem:[#allocation7 + $0x58] sm:$0xff]  ;;  %v184_v20 = vld [vmem:[#allocation7 + $0xd0] sm:$0xff] }
  0x2d   :  { %115 = vmatprep.subr.mxu0 %v62_v10  ;;  %300 = vmatprep.subr.mxu1 %v187_v13  ;;  %v168_v21 = vld [vmem:[#allocation7 + $0x50] sm:$0xff]  ;;  %v183_v22 = vld [vmem:[#allocation7 + $0xc8] sm:$0xff]  ;;  %v182_v24 = vld [vmem:[#allocation7 + $0xc0] sm:$0xff] }
  0x2e   :  { %116 = vmatpush1.msra.mxu0 %v61_v12  ;;  %301 = vmatpush3.msra.mxu1 %v171_v15  ;;  %v167_v23 = vld [vmem:[#allocation7 + $0x48] sm:$0xff]  ;;  %v166_v25 = vld [vmem:[#allocation7 + $0x40] sm:$0xff]  ;;  %v181_v26 = vld [vmem:[#allocation7 + $0xb8] sm:$0xff] }
  0x2f   :  { %294 = vmatmul.mubr.msk.f32.vlgmr.msra.gmra.mxu0 %vm81_vm0, %v60_v14  ;;  %302 = vmatprep.subr.mxu1 %v186_v16  ;;  %v165_v27 = vld [vmem:[#allocation7 + $0x38] sm:$0xff]  ;;  %v180_v28 = vld [vmem:[#allocation7 + $0xb0] sm:$0xff]  ;;  %v179_v30 = vld [vmem:[#allocation7 + $0xa8] sm:$0xff] }
  0x30   :  { %303 = vmatpush3.msra.mxu1 %v170_v17  ;;  %v164_v29 = vld [vmem:[#allocation7 + $0x30] sm:$0xff]  ;;  %v163_v31 = vld [vmem:[#allocation7 + $0x28] sm:$0xff]  ;;  %v178_v32 = vld [vmem:[#allocation7 + $0xa0] sm:$0xff] }
  0x31   :  { %304 = vmatprep.subr.mxu1 %v185_v18  ;;  %v162_v33 = vld [vmem:[#allocation7 + $0x20] sm:$0xff]  ;;  %v177_v34 = vld [vmem:[#allocation7 + $0x98] sm:$0xff]  ;;  %v176_v36 = vld [vmem:[#allocation7 + $0x90] sm:$0xff] }
  0x32   :  { %305 = vmatpush3.msra.mxu1 %v169_v19  ;;  %v161_v35 = vld [vmem:[#allocation7 + $0x18] sm:$0xff]  ;;  %v160_v37 = vld [vmem:[#allocation7 + $0x10] sm:$0xff]  ;;  %v175_v38 = vld [vmem:[#allocation7 + $0x88] sm:$0xff] }
  0x33   :  { %306 = vmatprep.subr.mxu1 %v184_v20  ;;  %v159_v39 = vld [vmem:[#allocation7 + $0x8] sm:$0xff]  ;;  %v174_v40 = vld [vmem:[#allocation7 + $0x80] sm:$0xff]  ;;  %v69_v45 = vld [vmem:[%s489_s2] sm:$0x3]  ;;  %s438_s2 = smov [#allocation8]  }
  0x34   :  { %307 = vmatpush3.msra.mxu1 %v168_v21  ;;  %v158_v41 = vld [vmem:[#allocation7] sm:$0xff]  ;;  %v74_v47 = vrot.slane %v69_v45, %v73_v44  ;;  %v78_v48 = vrot.slane %v69_v45, %v77_v46  ;;  %v295_v57 = vld [vmem:[%s491_s4] ss:$0 sm:$0xff]  ;;  %s284_s13 = sshll.u32 %s438_s2, 4  ;;  %s285_s13 = int_to_ptr.vmem [resolvable:$true] %s284_s13 }
  0x35   :  { %308 = vmatprep.subr.mxu1 %v183_v22  ;;  %s404_s14 = scalar_lea.vmem %s285_s13, 128  ;;  %p409_p2 = scmp.lt.s32.totalorder %s285_s13, %s285_s13 }
  0x36   :  { %309 = vmatpush3.msra.mxu1 %v167_v23  ;;  %p405_p1 = scmp.ne.s32.totalorder %s285_s13, %s404_s14  ;;  %p410_p3 = scmp.lt.s32.totalorder %s404_s14, %s404_s14 }
  0x37   :  { %310 = vmatprep.subr.mxu1 %v182_v24 }
  0x38   :  { %311 = vmatpush3.msra.mxu1 %v166_v25  ;;  %p411_p4 = por %p410_p3, %p409_p2 }
  0x39   :  { %312 = vmatprep.subr.mxu1 %v181_v26 }
  0x3a   :  { %313 = vmatpush3.msra.mxu1 %v165_v27  ;;  %p412_p5 = pnand %p411_p4, %p405_p1 }
  0x3b   :  { %314 = vmatprep.subr.mxu1 %v180_v28 }
  0x3c   :  { %315 = vmatpush3.msra.mxu1 %v164_v29 }
  0x3d   :  { %316 = vmatprep.subr.mxu1 %v179_v30 }
  0x3e   :  { %317 = vmatpush3.msra.mxu1 %v163_v31 }
  0x3f   :  { %318 = vmatprep.subr.mxu1 %v178_v32 }
  0x40   :  { %319 = vmatpush3.msra.mxu1 %v162_v33 }
  0x41   :  { %320 = vmatprep.subr.mxu1 %v177_v34 }
  0x42   :  { %321 = vmatpush3.msra.mxu1 %v161_v35 }
  0x43   :  { %322 = vmatprep.subr.mxu1 %v176_v36 }
  0x44   :  { %323 = vmatpush3.msra.mxu1 %v160_v37 }
  0x45   :  { %324 = vmatprep.subr.mxu1 %v175_v38 }
  0x46   :  { %325 = vmatpush3.msra.mxu1 %v159_v39 }
  0x47   :  { %326 = vmatprep.subr.mxu1 %v174_v40 }
  0x48   :  { %327 = vmatpush3.msra.mxu1 %v158_v41 }
  0xef   :  { %v151_v49 = vpop.f32.mrf.mxu0 }
  0xf0   :  { %v152_v50 = vadd.f32 %v151_v49, %v74_v47 }
  0xf1   :  { %v153_v51 = vpop.f32.mrf.mxu0 }
  0xf2   :  { %v154_v52 = vadd.f32 %v153_v51, %v78_v48  ;;  %v156_v54 = vmax.f32 %v152_v50, 0.0 }
  0xf4   :  { %v157_v53 = vmax.f32 %v154_v52, 0.0 }
  0xf6   :  { %261 = vmatprep.mubr.f32.mxu1 %v157_v53 }
  0xf7   :  { %262 = vmatmul.mubr.f32.vlgmr.msra.gmra.mxu1 %v156_v54 }
 0x1b7   :  { %v328_v55 = vpop.f32.mrf.mxu1 }
 0x1b9   :  { %v329_v56 = vpop.f32.mrf.mxu1 }
 0x1ba   :  { %v330_v58 = vadd.f32 %v329_v56, %v328_v55 }
 0x1bc   :  { %v264_v59 = vadd.f32 %v330_v58, %v295_v57 }
 0x1be   :  { %267 = vmax.xlane.f32.xlu0 %v264_v59 }
 0x247   :  { %v268_v60 = vpop.xlane.xlu0 %267 }
 0x248   :  { %v269_v61 = vsub.f32 %v264_v59, %v268_v60 }
 0x24a   :  { %v270_v62 = vmul.f32 1.442695, %v269_v61 }
 0x24c   :  { %340 = vpow2.f32 %v270_v62 }
 0x259   :  { %v341_v63 = vpop.eup %340 }
 0x25a   :  { %272 = vadd.xlane.f32.xlu0 %v341_v63 }
 0x2e3   :  { %v273_v0 = vpop.xlane.xlu0 %272 }
 0x2e4   :  { %342 = vlog2.f32 %v273_v0 }
 0x2f1   :  { %v343_v1 = vpop.eup %342 }
 0x2f2   :  { %v275_v2 = vmul.f32 0.6931472, %v343_v1 }
 0x2f4   :  { %v276_v3 = vsub.f32 %v269_v61, %v275_v2 }
 0x2f6   :  { %277 = vst [vmem:[#allocation8] sm:$0xff] %v276_v3 }
 0x2f7   :  { %415 = shalt.err (!%p412_p5)
}
 0x2f8   :  { %287 = dma.vmem_to_hbm [thread:$0]  %s285_s13, 128, %s492_s5, [#allocation4]  }
 0x2f9   :  { %428 = dma.done.wait [#allocation4], 128  }
 0x2fa   :  { %429 = vsyncadd [#allocation4], 4294967168 }
 0x2fb   :  { %291 = vsyncpa [#allocation3], 1 }
 0x2fc   :  { %292 = vsyncpa [#allocation6], 1 }
 0x2fd   :  { %293 = vsyncpa [#allocation4], 1 }

</bundles_post_ra>
